<compile_context>
chip_gen: v6e
topology: v6e:2x2x1
jax: 0.10.0
libtpu: 0.0.40
codegen_flags: <defaults>
</compile_context>

<pallas_src>
import math

import jax
import jax.numpy as jnp
from jax.experimental import pallas as pl
from jax.experimental.pallas import tpu as pltpu

IN_FEATURES = 8
OUT_FEATURES = 7
G = 16                        # original rows packed per lane-row
LANES_IN = G * IN_FEATURES    # 128  (fully lane-dense input)
LANES_OUT = G * OUT_FEATURES  # 112  (87.5% lane-dense output; do NOT grow G)


def _round_up(v, mult):
    return ((v + mult - 1) // mult) * mult


def _linear_hardsigmoid_kernel(x_ref, w_ref, b_ref, o_ref):
    # x_ref: (tm, 128) f32    w_ref: (128, 112) f32  block-diag(W^T / 6)
    # b_ref: (1, 112)  f32    (bias + 3) / 6, tiled over the 16 row-copies
    # o_ref: (tm, 112) f32
    y = jnp.dot(x_ref[...], w_ref[...], preferred_element_type=jnp.float32)
    y = y + b_ref[...]
    o_ref[...] = jnp.clip(y, 0.0, 1.0).astype(o_ref.dtype)  # hardsigmoid tail


def pack_params(weight, bias):
    """Block-diagonal packed weight/bias with the hardsigmoid +3 and /6 folded in.

    Build once per (weight, bias); under jit with captured params this is
    constant-folded away.
    """
    w_t = (weight.T / 6.0).astype(jnp.float32)                  # (8, 7)
    eye = jnp.eye(G, dtype=jnp.float32)                         # (16, 16)
    w_big = jnp.einsum("gh,kn->gkhn", eye, w_t).reshape(LANES_IN, LANES_OUT)
    b_big = jnp.tile((bias.astype(jnp.float32) + 3.0) / 6.0, (G,))
    return w_big, b_big.reshape(1, LANES_OUT)


def linear_hardsigmoid(x, weight, bias, *, tile_rows=8192, packed=None):
    """x: (..., 8)  weight: (7, 8)  bias: (7,)  ->  (..., 7)  (float32).

    tile_rows = max packed rows per block (8192 -> ~4 MiB in + 3.5 MiB out,
    ~15 MiB double-buffered; fits every generation with the raised VMEM limit).
    """
    lead = x.shape[:-1]
    assert x.shape[-1] == IN_FEATURES
    m = math.prod(lead) if lead else 1
    if m == 0:
        return jnp.zeros((*lead, OUT_FEATURES), jnp.float32)

    w_big, b_big = pack_params(weight, bias) if packed is None else packed

    x2d = x.reshape(m, IN_FEATURES)
    if x2d.dtype != jnp.float32:
        x2d = x2d.astype(jnp.float32)

    m_main = (m // G) * G
    outs = []

    if m_main > 0:
        xm = x2d if m_main == m else x2d[:m_main]
        mp = m_main // G
        xp = xm.reshape(mp, LANES_IN)               # (mp, 128), contiguous

        # >=4 blocks so v7x megacore splits the work and DMA/compute overlap,
        # capped at tile_rows packed rows per block; tm is a multiple of 8.
        tm = min(tile_rows, max(8, _round_up(pl.cdiv(mp, 4), 8)))
        grid = (pl.cdiv(mp, tm),)                   # ragged last block is fine:
                                                    # garbage tail rows never stored

        out = pl.pallas_call(
            _linear_hardsigmoid_kernel,
            out_shape=jax.ShapeDtypeStruct((mp, LANES_OUT), jnp.float32),
            grid=grid,
            in_specs=[
                pl.BlockSpec((tm, LANES_IN), lambda i: (i, 0)),
                pl.BlockSpec((LANES_IN, LANES_OUT), lambda i: (0, 0)),
                pl.BlockSpec((1, LANES_OUT), lambda i: (0, 0)),
            ],
            out_specs=pl.BlockSpec((tm, LANES_OUT), lambda i: (i, 0)),
            compiler_params=pltpu.CompilerParams(
                dimension_semantics=("parallel",),
                vmem_limit_bytes=32 * 1024 * 1024,   # above v5e's 16 MiB default
            ),
        )(xp, w_big, b_big)
        # Un-pack: packed row r, col h*7+n -> original row r*16+h, feature n.
        outs.append(out.reshape(m_main, OUT_FEATURES))

    if m_main != m:
        # <=15-row ragged tail: cheaper in plain XLA than padding the whole input.
        tail = x2d[m_main:]
        tail_y = jnp.clip(tail @ weight.T.astype(jnp.float32)
                          + bias.astype(jnp.float32) + 3.0, 0.0, 6.0) / 6.0
        outs.append(tail_y)

    y = outs[0] if len(outs) == 1 else jnp.concatenate(outs, axis=0)
    # TODO(synk): emit bfloat16 output (halves the dominant store traffic) if the
    # downstream consumer tolerates ~3e-3 relative error; kept f32 for exactness.
    return y.reshape(*lead, OUT_FEATURES)


if __name__ == "__main__":
    key = jax.random.PRNGKey(0)
    kx, kw, kb = jax.random.split(key, 3)

    # Small shapes consistent with the module: Linear expects last dim == 8.
    x = jax.random.normal(kx, (2, 4, 16, IN_FEATURES), dtype=jnp.float32)

    # Deterministic "Linear(8, 7)" parameters (torch-style uniform init bound).
    bound = 1.0 / (IN_FEATURES ** 0.5)
    weight = jax.random.uniform(
        kw, (OUT_FEATURES, IN_FEATURES), minval=-bound, maxval=bound,
        dtype=jnp.float32)
    bias = jax.random.uniform(
        kb, (OUT_FEATURES,), minval=-bound, maxval=bound, dtype=jnp.float32)

    # jit with weight/bias captured -> packed w_big/b_big constant-folded once.
    fwd = jax.jit(lambda xx: linear_hardsigmoid(xx, weight, bias))
    out = fwd(x)
    jax.block_until_ready(out)

    # Reference check in plain JAX (matches the torch forward).
    ref = jnp.clip(x @ weight.T + bias + 3.0, 0.0, 6.0) / 6.0
    assert out.shape == (2, 4, 16, OUT_FEATURES)
    assert jnp.allclose(out, ref, atol=1e-5, rtol=1e-5)

    print("KERNEL_OK")
</pallas_src>

<mosaic_0001>
module attributes {stable_mosaic.version = 11 : i64} {
  func.func @_linear_hardsigmoid_kernel(%arg0: i32, %arg1: memref<8x128xf32, #tpu.memory_space<vmem>>, %arg2: memref<128x112xf32, #tpu.memory_space<vmem>>, %arg3: memref<1x112xf32, #tpu.memory_space<vmem>>, %arg4: memref<8x112xf32, #tpu.memory_space<vmem>>) attributes {dimension_semantics = [#tpu.dimension_semantics<parallel>], iteration_bounds = array<i64: 1>, scalar_prefetch = 0 : i64, scratch_operands = 0 : i64, tpu.core_type = #tpu.core_type<tc>, window_params = [{transform_indices = @transform_0, window_bounds = array<i64: 8, 128>}, {pipeline_mode = #tpu.pipeline_mode<synchronous>, transform_indices = @transform_1, window_bounds = array<i64: 128, 112>}, {pipeline_mode = #tpu.pipeline_mode<synchronous>, transform_indices = @transform_2, window_bounds = array<i64: 1, 112>}, {transform_indices = @transform_3, window_bounds = array<i64: 8, 112>}]} {
    %c0 = arith.constant 0 : index
    %c0_0 = arith.constant 0 : index
    %0 = vector.load %arg1[%c0, %c0_0] : memref<8x128xf32, #tpu.memory_space<vmem>>, vector<8x128xf32>
    %c0_1 = arith.constant 0 : index
    %c0_2 = arith.constant 0 : index
    %1 = vector.load %arg2[%c0_1, %c0_2] : memref<128x112xf32, #tpu.memory_space<vmem>>, vector<128x112xf32>
    %cst = arith.constant dense<0.000000e+00> : vector<8x112xf32>
    %2 = tpu.matmul %0, %1, %cst {dimension_numbers = #tpu.dot_dimension_numbers<[1], [0], [0], [1], [0, 0, 1, 1], [], []>} : vector<8x128xf32>, vector<128x112xf32>, vector<8x112xf32> -> vector<8x112xf32>
    %c0_3 = arith.constant 0 : index
    %c0_4 = arith.constant 0 : index
    %3 = vector.load %arg3[%c0_3, %c0_4] : memref<1x112xf32, #tpu.memory_space<vmem>>, vector<1x112xf32>
    %4 = vector.broadcast %3 : vector<1x112xf32> to vector<8x112xf32>
    %5 = arith.addf %2, %4 : vector<8x112xf32>
    %cst_5 = arith.constant 0.000000e+00 : f32
    %cst_6 = arith.constant 1.000000e+00 : f32
    %6 = vector.broadcast %cst_5 : f32 to vector<8x112xf32>
    %7 = arith.maximumf %6, %5 : vector<8x112xf32>
    %8 = vector.broadcast %cst_6 : f32 to vector<8x112xf32>
    %9 = arith.minimumf %8, %7 : vector<8x112xf32>
    %c0_7 = arith.constant 0 : index
    %c0_8 = arith.constant 0 : index
    %10 = vector.load %arg4[%c0_7, %c0_8] : memref<8x112xf32, #tpu.memory_space<vmem>>, vector<8x112xf32>
    tpu.vector_store %arg4[%c0_7, %c0_8], %9 {strides = array<i32>} : memref<8x112xf32, #tpu.memory_space<vmem>>, vector<8x112xf32>,
    return
  }
  func.func @transform_0(%arg0: i32) -> (i32, i32) {
    %c0_i32 = arith.constant 0 : i32
    %c0_i32_0 = arith.constant 0 : i32
    return %arg0, %c0_i32 : i32, i32
  }
  func.func @transform_1(%arg0: i32) -> (i32, i32) {
    %c0_i32 = arith.constant 0 : i32
    %c0_i32_0 = arith.constant 0 : i32
    %c0_i32_1 = arith.constant 0 : i32
    return %c0_i32, %c0_i32_0 : i32, i32
  }
  func.func @transform_2(%arg0: i32) -> (i32, i32) {
    %c0_i32 = arith.constant 0 : i32
    %c0_i32_0 = arith.constant 0 : i32
    %c0_i32_1 = arith.constant 0 : i32
    return %c0_i32, %c0_i32_0 : i32, i32
  }
  func.func @transform_3(%arg0: i32) -> (i32, i32) {
    %c0_i32 = arith.constant 0 : i32
    %c0_i32_0 = arith.constant 0 : i32
    return %arg0, %c0_i32 : i32, i32
  }
}

</mosaic_0001>

<bundles_post_ra>
// kernel: tile.6
= control target key start
LH: loop header
LB: loop body
LE: loop exit
PB: predicated region body
PF: predicated region fallthrough
CT: control target
= control target key end

     0   :  { %s28_s0 = inlined_call_operand.vmem [shape: f32[7], index: 0, kind: input, shape index: {}]   ;;  %s29_s1 = inlined_call_operand.vmem [shape: f32[16,7], index: 1, kind: output, shape index: {}]  }
   0x1   :  { %v4_v0 = vld [vmem:[%s28_s0] ss:$0 sm:$0xff] }
   0x2   :  { %5 = vst [vmem:[%s29_s1] sm:$0xff] %v4_v0  ;;  %8 = vst [vmem:[%s29_s1 + $0x8] sm:$0xff] %v4_v0 }

// kernel: tile.7
= control target key start
LH: loop header
LB: loop body
LE: loop exit
PB: predicated region body
PF: predicated region fallthrough
CT: control target
= control target key end

     0   :  { %s133_s10 = smov 105   ;;  %s134_s11 = smov 91   ;;  %vm3_vm0 = vcmask 56320   ;;  %vm9_vm1 = vcmask 917320   ;;  %vm15_vm2 = vcmask 859920   ;;  %vm21_vm3 = vcmask 802520   ;;  %s209_s0 = inlined_call_operand.vmem [shape: f32[16,7], index: 0, kind: input, shape index: {}]   ;;  %s210_s1 = inlined_call_operand.vmem [shape: f32[1,112], index: 1, kind: output, shape index: {}]  }
   0x1   :  { %v103_v0 = vld [vmem:[%s209_s0 + $0xf] sm:$0x1]   ;;  %v105_v1 = vld [vmem:[%s209_s0 + $0xd] sm:$0x1]   ;;  %v104_v2 = vld [vmem:[%s209_s0 + $0xe] sm:$0x1]  }
   0x2   :  { %7 = vrot.lane.b32.xlu0 %v103_v0, %s133_s10  ;;  %19 = vrot.lane.b32.xlu1 %v105_v1, %s134_s11  ;;  %v106_v3 = vld [vmem:[%s209_s0 + $0xc] sm:$0x1]   ;;  %s135_s16 = smov 98   ;;  %s136_s17 = smov 84   ;;  %v107_v4 = vld [vmem:[%s209_s0 + $0xb] sm:$0x1]  }
   0x3   :  { %v108_v5 = vld [vmem:[%s209_s0 + $0xa] sm:$0x1]   ;;  %v2_v6 = vld [vmem:[%s209_s0] sm:$0x1]   ;;  %s137_s24 = smov 77   ;;  %s138_s25 = smov 70  }
   0x4   :  { %4 = vst.msk [vmem:[#allocation0] sm:$0x1] %vm3_vm0, %v2_v6   ;;  %v109_v7 = vld [vmem:[%s209_s0 + $0x9] sm:$0x1]   ;;  %v110_v8 = vld [vmem:[%s209_s0 + $0x8] sm:$0x1]  }
   0x5   :  { %s139_s30 = smov 63   ;;  %s140_s2 = smov 56   ;;  %v111_v9 = vld [vmem:[%s209_s0 + $0x7] sm:$0x1]   ;;  %v112_v10 = vld [vmem:[%s209_s0 + $0x6] sm:$0x1]  }
   0x6   :  { %13 = vrot.lane.b32.xlu0 %v104_v2, %s135_s16  ;;  %25 = vrot.lane.b32.xlu1 %v106_v3, %s136_s17  ;;  %s141_s7 = smov 49   ;;  %s142_s8 = smov 42   ;;  %v113_v11 = vld [vmem:[%s209_s0 + $0x5] sm:$0x1]   ;;  %v114_v12 = vld [vmem:[%s209_s0 + $0x4] sm:$0x1]  }
   0x7   :  { %s143_s13 = smov 35   ;;  %s144_s14 = smov 28   ;;  %v115_v13 = vld [vmem:[%s209_s0 + $0x3] sm:$0x1]   ;;  %v116_v14 = vld [vmem:[%s209_s0 + $0x2] sm:$0x1]  }
   0x8   :  { %s145_s19 = smov 21   ;;  %s146_s20 = smov 14   ;;  %v117_v15 = vld [vmem:[%s209_s0 + $0x1] sm:$0x1]   ;;  %vm27_vm4 = vcmask 745120   ;;  %vm33_vm5 = vcmask 687720  }
   0x9   :  { %s147_s0 = smov 7   ;;  %vm39_vm6 = vcmask 630320   ;;  %vm45_vm7 = vcmask 572920   ;;  %vm51_vm8 = vcmask 515520   ;;  %vm57_vm9 = vcmask 458120  }
   0xa   :  { %31 = vrot.lane.b32.xlu0 %v107_v4, %s137_s24  ;;  %37 = vrot.lane.b32.xlu1 %v108_v5, %s138_s25  ;;  %vm63_vm10 = vcmask 400720   ;;  %vm69_vm11 = vcmask 343320   ;;  %vm75_vm12 = vcmask 285920   ;;  %vm81_vm13 = vcmask 228520  }
   0xb   :  { %vm87_vm14 = vcmask 171120   ;;  %vm93_vm15 = vcmask 113720  }
   0xe   :  { %43 = vrot.lane.b32.xlu0 %v109_v7, %s139_s30  ;;  %49 = vrot.lane.b32.xlu1 %v110_v8, %s140_s2 }
  0x12   :  { %55 = vrot.lane.b32.xlu0 %v111_v9, %s141_s7  ;;  %61 = vrot.lane.b32.xlu1 %v112_v10, %s142_s8 }
  0x16   :  { %67 = vrot.lane.b32.xlu0 %v113_v11, %s143_s13  ;;  %73 = vrot.lane.b32.xlu1 %v114_v12, %s144_s14 }
  0x1a   :  { %79 = vrot.lane.b32.xlu0 %v115_v13, %s145_s19  ;;  %85 = vrot.lane.b32.xlu1 %v116_v14, %s146_s20 }
  0x1e   :  { %91 = vrot.lane.b32.xlu0 %v117_v15, %s147_s0 }
  0x74   :  { %v8_v16 = vpop.permute.xlu0 %7   ;;  %v20_v17 = vpop.permute.xlu1 %19  }
  0x75   :  { %10 = vst.msk [vmem:[#allocation0] sm:$0x1] %vm9_vm1, %v8_v16  }
  0x78   :  { %v14_v18 = vpop.permute.xlu0 %13   ;;  %v26_v19 = vpop.permute.xlu1 %25  }
  0x79   :  { %16 = vst.msk [vmem:[#allocation0] sm:$0x1] %vm15_vm2, %v14_v18  }
  0x7a   :  { %22 = vst.msk [vmem:[#allocation0] sm:$0x1] %vm21_vm3, %v20_v17  }
  0x7b   :  { %28 = vst.msk [vmem:[#allocation0] sm:$0x1] %vm27_vm4, %v26_v19  }
  0x7c   :  { %v32_v20 = vpop.permute.xlu0 %31   ;;  %v38_v21 = vpop.permute.xlu1 %37  }
  0x7d   :  { %34 = vst.msk [vmem:[#allocation0] sm:$0x1] %vm33_vm5, %v32_v20  }
  0x7e   :  { %40 = vst.msk [vmem:[#allocation0] sm:$0x1] %vm39_vm6, %v38_v21  }
  0x80   :  { %v44_v22 = vpop.permute.xlu0 %43   ;;  %v50_v23 = vpop.permute.xlu1 %49  }
  0x81   :  { %46 = vst.msk [vmem:[#allocation0] sm:$0x1] %vm45_vm7, %v44_v22  }
  0x82   :  { %52 = vst.msk [vmem:[#allocation0] sm:$0x1] %vm51_vm8, %v50_v23  }
  0x84   :  { %v56_v24 = vpop.permute.xlu0 %55   ;;  %v62_v25 = vpop.permute.xlu1 %61  }
  0x85   :  { %58 = vst.msk [vmem:[#allocation0] sm:$0x1] %vm57_vm9, %v56_v24  }
  0x86   :  { %64 = vst.msk [vmem:[#allocation0] sm:$0x1] %vm63_vm10, %v62_v25  }
  0x88   :  { %v68_v26 = vpop.permute.xlu0 %67   ;;  %v74_v27 = vpop.permute.xlu1 %73  }
  0x89   :  { %70 = vst.msk [vmem:[#allocation0] sm:$0x1] %vm69_vm11, %v68_v26  }
  0x8a   :  { %76 = vst.msk [vmem:[#allocation0] sm:$0x1] %vm75_vm12, %v74_v27  }
  0x8c   :  { %v80_v28 = vpop.permute.xlu0 %79   ;;  %v86_v29 = vpop.permute.xlu1 %85  }
  0x8d   :  { %82 = vst.msk [vmem:[#allocation0] sm:$0x1] %vm81_vm13, %v80_v28  }
  0x8e   :  { %88 = vst.msk [vmem:[#allocation0] sm:$0x1] %vm87_vm14, %v86_v29  }
  0x90   :  { %v92_v30 = vpop.permute.xlu0 %91  }
  0x91   :  { %94 = vst.msk [vmem:[#allocation0] sm:$0x1] %vm93_vm15, %v92_v30  }
  0x98   :  { %v99_v31 = vld [vmem:[#allocation0] sm:$0x1] }
  0x99   :  { %102 = vst [vmem:[%s210_s1] sm:$0x1] %v99_v31 }

// kernel: _lambda_.1
= control target key start
LH: loop header
LB: loop body
LE: loop exit
PB: predicated region body
PF: predicated region fallthrough
CT: control target
= control target key end

     0   :  { %v171_v0 = vmov 0.0   ;;  %vm172_vm0 = vmmov 0   ;;  %vm110_vm1 = vcmask 916480   ;;  %s250_s1 = inlined_call_operand.vmem [shape: f32[128,112], index: 1, kind: input, shape index: {}]   ;;  %s251_s0 = inlined_call_operand.vmem [shape: f32[8,128], index: 0, kind: input, shape index: {}]   ;;  %s252_s2 = inlined_call_operand.vmem [shape: f32[1,112], index: 2, kind: input, shape index: {}]   ;;  %s253_s3 = inlined_call_operand.vmem [shape: f32[8,112], index: 3, kind: output, shape index: {}]  }
   0x1   :  { %134 = vmatprep.subr.mxu0 %v171_v0  ;;  %v30_v1 = vld [vmem:[%s250_s1 + $0x78] sm:$0xff]  ;;  %v29_v2 = vld [vmem:[%s250_s1 + $0x70] sm:$0xff]  ;;  %166 = vmatprep.mubr.msk.f32.mxu0 %vm172_vm0, %v171_v0  ;;  %v28_v3 = vld [vmem:[%s250_s1 + $0x68] sm:$0xff] }
   0x2   :  { %135 = vmatpush3.msra.mxu0 %v30_v1  ;;  %v27_v4 = vld [vmem:[%s250_s1 + $0x60] sm:$0xff]  ;;  %v26_v5 = vld [vmem:[%s250_s1 + $0x58] sm:$0xff]  ;;  %v25_v6 = vld [vmem:[%s250_s1 + $0x50] sm:$0xff] }
   0x3   :  { %136 = vmatprep.subr.mxu0 %v171_v0  ;;  %v24_v7 = vld [vmem:[%s250_s1 + $0x48] sm:$0xff]  ;;  %v23_v8 = vld [vmem:[%s250_s1 + $0x40] sm:$0xff]  ;;  %v22_v9 = vld [vmem:[%s250_s1 + $0x38] sm:$0xff] }
   0x4   :  { %137 = vmatpush3.msra.mxu0 %v29_v2  ;;  %v21_v10 = vld [vmem:[%s250_s1 + $0x30] sm:$0xff]  ;;  %v20_v11 = vld [vmem:[%s250_s1 + $0x28] sm:$0xff]  ;;  %v19_v12 = vld [vmem:[%s250_s1 + $0x20] sm:$0xff] }
   0x5   :  { %138 = vmatprep.subr.mxu0 %v171_v0  ;;  %v18_v13 = vld [vmem:[%s250_s1 + $0x18] sm:$0xff]  ;;  %v17_v14 = vld [vmem:[%s250_s1 + $0x10] sm:$0xff]  ;;  %v16_v15 = vld [vmem:[%s250_s1 + $0x8] sm:$0xff] }
   0x6   :  { %139 = vmatpush3.msra.mxu0 %v28_v3  ;;  %v15_v16 = vld [vmem:[%s250_s1] sm:$0xff] }
   0x7   :  { %140 = vmatprep.subr.mxu0 %v171_v0  ;;  %v14_v17 = vld [vmem:[%s251_s0] sm:$0xff] }
   0x8   :  { %141 = vmatpush3.msra.mxu0 %v27_v4  ;;  %v116_v18 = vld [vmem:[%s252_s2] ss:$0 sm:$0xff] }
   0x9   :  { %142 = vmatprep.subr.mxu0 %v171_v0 }
   0xa   :  { %143 = vmatpush3.msra.mxu0 %v26_v5 }
   0xb   :  { %144 = vmatprep.subr.mxu0 %v171_v0 }
   0xc   :  { %145 = vmatpush3.msra.mxu0 %v25_v6 }
   0xd   :  { %146 = vmatprep.subr.mxu0 %v171_v0 }
   0xe   :  { %147 = vmatpush3.msra.mxu0 %v24_v7 }
   0xf   :  { %148 = vmatprep.subr.mxu0 %v171_v0 }
  0x10   :  { %149 = vmatpush3.msra.mxu0 %v23_v8 }
  0x11   :  { %150 = vmatprep.subr.mxu0 %v171_v0 }
  0x12   :  { %151 = vmatpush3.msra.mxu0 %v22_v9 }
  0x13   :  { %152 = vmatprep.subr.mxu0 %v171_v0 }
  0x14   :  { %153 = vmatpush3.msra.mxu0 %v21_v10 }
  0x15   :  { %154 = vmatprep.subr.mxu0 %v171_v0 }
  0x16   :  { %155 = vmatpush3.msra.mxu0 %v20_v11 }
  0x17   :  { %156 = vmatprep.subr.mxu0 %v171_v0 }
  0x18   :  { %157 = vmatpush3.msra.mxu0 %v19_v12 }
  0x19   :  { %158 = vmatprep.subr.mxu0 %v171_v0 }
  0x1a   :  { %159 = vmatpush3.msra.mxu0 %v18_v13 }
  0x1b   :  { %160 = vmatprep.subr.mxu0 %v171_v0 }
  0x1c   :  { %161 = vmatpush3.msra.mxu0 %v17_v14 }
  0x1d   :  { %162 = vmatprep.subr.mxu0 %v171_v0 }
  0x1e   :  { %163 = vmatpush3.msra.mxu0 %v16_v15 }
  0x1f   :  { %164 = vmatprep.subr.mxu0 %v171_v0 }
  0x20   :  { %165 = vmatpush3.msra.mxu0 %v15_v16 }
  0x21   :  { %167 = vmatmul.mubr.f32.vlgmr.msra.gmra.mxu0 %v14_v17 }
  0xe1   :  { %v104_v19 = vpop.f32.mrf.mxu0 }
  0xe2   :  { %v105_v20 = vadd.f32 %v116_v18, %v104_v19 }
  0xe3   :  { %v168_v21 = vpop.f32.mrf.mxu0 }
  0xe4   :  { %v108_v22 = vmax.f32 %v105_v20, 0.0 }
  0xe6   :  { %v109_v23 = vmin.f32 %v108_v22, 1.0 }
  0xe8   :  { %111 = vst.msk [vmem:[%s253_s3] sm:$0xff] %vm110_vm1, %v109_v23 }

</bundles_post_ra>
